<compile_context>
chip_gen: v5e
topology: v5e:2x2
jax: 0.10.0
libtpu: 0.0.40
codegen_flags: <defaults>
</compile_context>

<pallas_src>
import functools

import jax
import jax.numpy as jnp
from jax import lax
from jax.experimental import pallas as pl
from jax.experimental.pallas import tpu as pltpu


# ------------------------------- Pallas kernel ------------------------------

def recurnet_kernel(x_ref, w1_ref, wb_ref, w2_ref, w3_ref, w4_ref, o_ref, *,
                    iters, seq_len):
    n = x_ref.shape[1]               # lanes per step = Bt * L
    num_blocks = wb_ref.shape[0]
    width = wb_ref.shape[2]          # W   (wbf block is (W, 3W))
    half = w4_ref.shape[1] // 3      # W/2 (w4f is (2, 3*(W/2)))
    cdt = w2_ref.dtype               # MXU operand dtype (f32 or bf16)
    L = seq_len

    # ---- boundary masks: built in-kernel (no input DMA), hoisted/pre-broadcast
    pos = lax.broadcasted_iota(jnp.int32, (1, n), 1) % L
    nf1 = (pos != 0).astype(jnp.float32)          # (1, n): 0 where l == 0
    nl1 = (pos != L - 1).astype(jnp.float32)      # (1, n): 0 where l == L-1
    nf_w = jnp.broadcast_to(nf1.astype(cdt), (width, n))
    nl_w = jnp.broadcast_to(nl1.astype(cdt), (width, n))
    nf_h = nf_w[:half]
    nl_h = nl_w[:half]

    def conv_k3(x, w, nf, nl):
        """'same' k=3 conv as one MXU matmul.

        x: (Cin, N) f32, w: (Cout, 3*Cin) cdt -> (Cout, N) f32.
        Shifts along the lane axis via XLU roll; {0,1} masks restore zero padding
        and stop rows leaking across sequence boundaries; concat is sublane-aligned.
        """
        xc = x.astype(cdt)
        xm1 = pltpu.roll(xc, 1, axis=1) * nf            # x[l-1]
        xp1 = pltpu.roll(xc, n - 1, axis=1) * nl        # x[l+1]
        x3 = jnp.concatenate([xm1, xc, xp1], axis=0)    # (3*Cin, N)
        return jnp.dot(w, x3, preferred_element_type=jnp.float32)

    # ---- conv1 (Cin=1): pure VPU — three broadcast multiply-adds, no MXU pass
    x0 = x_ref[...].astype(jnp.float32)                 # (1, n)
    xm1 = pltpu.roll(x0, 1, axis=1) * nf1
    xp1 = pltpu.roll(x0, n - 1, axis=1) * nl1
    w1 = w1_ref[...]                                    # (W, 3) f32
    out = jnp.maximum(
        w1[:, 0:1] * xm1 + w1[:, 1:2] * x0 + w1[:, 2:3] * xp1, 0.0)   # (W, n)

    # ---- recurrent residual blocks (same weights every iteration)
    if width <= 64:
        # hoist the tiny recurrent weights into vregs once (~12 vregs at W=32)
        wb_vals = [[wb_ref[b, 0], wb_ref[b, 1]] for b in range(num_blocks)]
        get_wb = lambda b, s: wb_vals[b][s]
    else:
        get_wb = lambda b, s: wb_ref[b, s]              # per-use Ref load

    def recur_once(h):
        for b in range(num_blocks):
            y = jnp.maximum(conv_k3(h, get_wb(b, 0), nf_w, nl_w), 0.0)
            y = conv_k3(y, get_wb(b, 1), nf_w, nl_w)
            h = jnp.maximum(y + h, 0.0)                 # identity shortcut + relu
        return h

    if iters <= 8:
        for _ in range(iters):                          # small: static unroll
            out = recur_once(out)
    else:
        out = lax.fori_loop(0, iters, lambda _, h: recur_once(h), out, unroll=2)

    # ---- projection head: conv2 -> relu -> conv3 -> relu -> conv4
    t = jnp.maximum(conv_k3(out, w2_ref[...], nf_w, nl_w), 0.0)   # (W,  n)
    t = jnp.maximum(conv_k3(t, w3_ref[...], nf_w, nl_w), 0.0)     # (W/2, n)
    t = conv_k3(t, w4_ref[...], nf_h, nl_h)                        # (2,  n) lane-dense

    o_ref[...] = t.astype(o_ref.dtype)


# --------------------------------- wrapper ----------------------------------

def recurnet_forward(x_ncl, params, *, iters, num_blocks, batch_tile=None,
                     compute_dtype=jnp.float32, vmem_limit_bytes=None):
    """x_ncl: (B, 1, L) float32 (PyTorch NCL). Returns (B, 2, L) float32."""
    w1, wb, w2, w3, w4 = params
    B, cin, L = x_ncl.shape
    assert cin == 1
    W = w2.shape[1]
    if batch_tile is None:
        batch_tile = B                               # one big step: N = B*L lanes
    Bt = batch_tile
    assert B % Bt == 0, "batch_tile must divide batch"
    N = Bt * L                                       # lanes per grid step
    # Lane-dim blocks must be 128-aligned unless they span the full array.
    assert N == B * L or N % 128 == 0, "Bt*L must be a multiple of 128 (or Bt == B)"

    # Fold the 3 taps into the contraction dim, output channels first:
    # (3, Cin, Cout) -> (Cout, 3*Cin), K laid out tap-major then Cin.
    def fold(w):
        k, ci, co = w.shape
        return jnp.transpose(w, (2, 0, 1)).reshape(co, k * ci).astype(compute_dtype)

    w1f = jnp.transpose(w1, (2, 0, 1)).reshape(W, 3).astype(jnp.float32)  # VPU conv1
    wbf = jnp.transpose(wb, (0, 1, 4, 2, 3)).reshape(
        num_blocks, 2, W, 3 * W).astype(compute_dtype)
    w2f, w3f, w4f = fold(w2), fold(w3), fold(w4)

    # Transposed layout: channels on sublanes, flat positions (b*L + l) on lanes.
    x_lanes = x_ncl.reshape(B, L).reshape(1, B * L)

    kern = functools.partial(recurnet_kernel, iters=iters, seq_len=L)

    def full_spec(a):
        return pl.BlockSpec(a.shape, lambda i, _nd=a.ndim: (0,) * _nd)

    out_lanes = pl.pallas_call(
        kern,
        out_shape=jax.ShapeDtypeStruct((2, B * L), jnp.float32),
        grid_spec=pltpu.PrefetchScalarGridSpec(
            num_scalar_prefetch=0,
            grid=(B // Bt,),
            in_specs=[
                pl.BlockSpec((1, N), lambda i: (0, i)),   # x, per batch-tile
                full_spec(w1f), full_spec(wbf), full_spec(w2f),
                full_spec(w3f), full_spec(w4f),
            ],
            out_specs=pl.BlockSpec((2, N), lambda i: (0, i)),  # lane-dense output
        ),
        compiler_params=pltpu.CompilerParams(
            dimension_semantics=("parallel",),            # shards batch tiles on v7x
            vmem_limit_bytes=vmem_limit_bytes),
    )(x_lanes, w1f, wbf, w2f, w3f, w4f)

    # (2, B*L) -> (B, 2, L) to match the PyTorch module's NCL output.
    return jnp.transpose(out_lanes.reshape(2, B, L), (1, 0, 2))


# --------------------------- pure-JAX reference ------------------------------

def _ref_conv1d(x_ncl, w_kio):
    """PyTorch-style Conv1d, k=3, p=1, no bias. x: (B, C, L), w: (3, Cin, Cout)."""
    w_oik = jnp.transpose(w_kio, (2, 1, 0))              # (Cout, Cin, K)
    return lax.conv_general_dilated(
        x_ncl, w_oik, window_strides=(1,), padding=[(1, 1)],
        dimension_numbers=("NCH", "OIH", "NCH"))


def recurnet_reference(x_ncl, params, *, iters, num_blocks):
    w1, wb, w2, w3, w4 = params
    out = jax.nn.relu(_ref_conv1d(x_ncl, w1))
    for _ in range(iters):
        for b in range(num_blocks):
            h = jax.nn.relu(_ref_conv1d(out, wb[b, 0]))
            h = _ref_conv1d(h, wb[b, 1])
            out = jax.nn.relu(h + out)
    t = jax.nn.relu(_ref_conv1d(out, w2))
    t = jax.nn.relu(_ref_conv1d(t, w3))
    return _ref_conv1d(t, w4)


# ----------------------------------- main ------------------------------------

def init_params(key, width, num_blocks):
    """Deterministic synthetic weights, stored as (K=3, Cin, Cout)."""
    ks = jax.random.split(key, 5)

    def w(k, shape):
        fan_in = shape[-2] * 3
        return jax.random.normal(k, shape, jnp.float32) / jnp.sqrt(fan_in)

    w1 = w(ks[0], (3, 1, width))                               # conv1
    wb = w(ks[1], (num_blocks, 2, 3, width, width))            # recur block convs
    w2 = w(ks[2], (3, width, width))                           # conv2
    w3 = w(ks[3], (3, width, width // 2))                      # conv3
    w4 = w(ks[4], (3, width // 2, 2))                          # conv4
    return (w1, wb, w2, w3, w4)


if __name__ == "__main__":
    B, L = 8, 16
    width = 32
    num_blocks = 2            # recur_block has 2 residual BasicBlocks
    depth = 12
    assert (depth - 4) % 4 == 0
    iters = (depth - 4) // 4  # = 2 recurrent applications of the block

    key = jax.random.PRNGKey(0)
    kx, kp = jax.random.split(key)
    x = jax.random.normal(kx, (B, 1, L), jnp.float32)   # (B, Cin=1, L), NCL like PyTorch
    params = init_params(kp, width, num_blocks)

    ref = recurnet_reference(x, params, iters=iters, num_blocks=num_blocks)
    ref = jax.block_until_ready(ref)

    # f32 MXU operands (default at this small width), one 128-lane grid step.
    out = recurnet_forward(x, params, iters=iters, num_blocks=num_blocks)
    out = jax.block_until_ready(out)
    assert out.shape == (B, 2, L), out.shape
    assert jnp.allclose(out, ref, atol=2e-4, rtol=2e-4), "f32 mismatch vs reference"

    # bf16 MXU-operand path (valid on v5e/v6e/v7x); loose-tolerance checked.
    out_bf16 = recurnet_forward(x, params, iters=iters, num_blocks=num_blocks,
                                compute_dtype=jnp.bfloat16)
    out_bf16 = jax.block_until_ready(out_bf16)
    assert out_bf16.shape == (B, 2, L)
    assert bool(jnp.all(jnp.isfinite(out_bf16)))
    assert jnp.allclose(out_bf16, ref, atol=0.25, rtol=0.1), "bf16 drift too large"

    print("KERNEL_OK")
</pallas_src>

<mosaic_0001>
module attributes {stable_mosaic.version = 11 : i64} {
  func.func @recurnet_kernel(%arg0: i32, %arg1: memref<1x128xf32, #tpu.memory_space<vmem>>, %arg2: memref<32x3xf32, #tpu.memory_space<vmem>>, %arg3: memref<2x2x32x96xf32, #tpu.memory_space<vmem>>, %arg4: memref<32x96xf32, #tpu.memory_space<vmem>>, %arg5: memref<16x96xf32, #tpu.memory_space<vmem>>, %arg6: memref<2x48xf32, #tpu.memory_space<vmem>>, %arg7: memref<2x128xf32, #tpu.memory_space<vmem>>) attributes {dimension_semantics = [#tpu.dimension_semantics<parallel>], iteration_bounds = array<i64: 1>, scalar_prefetch = 0 : i64, scratch_operands = 0 : i64, tpu.core_type = #tpu.core_type<tc>, window_params = [{transform_indices = @transform_0, window_bounds = array<i64: 1, 128>}, {pipeline_mode = #tpu.pipeline_mode<synchronous>, transform_indices = @transform_1, window_bounds = array<i64: 32, 3>}, {pipeline_mode = #tpu.pipeline_mode<synchronous>, transform_indices = @transform_2, window_bounds = array<i64: 2, 2, 32, 96>}, {pipeline_mode = #tpu.pipeline_mode<synchronous>, transform_indices = @transform_3, window_bounds = array<i64: 32, 96>}, {pipeline_mode = #tpu.pipeline_mode<synchronous>, transform_indices = @transform_4, window_bounds = array<i64: 16, 96>}, {pipeline_mode = #tpu.pipeline_mode<synchronous>, transform_indices = @transform_5, window_bounds = array<i64: 2, 48>}, {transform_indices = @transform_6, window_bounds = array<i64: 2, 128>}]} {
    %0 = tpu.iota {dimensions = array<i32: 1>} : vector<1x128xi32>
    %c16_i32 = arith.constant 16 : i32
    %c0_i32 = arith.constant 0 : i32
    %1 = arith.cmpi eq, %c16_i32, %c0_i32 : i32
    %c1_i32 = arith.constant 1 : i32
    %2 = arith.select %1, %c1_i32, %c16_i32 : i32
    %3 = vector.broadcast %2 : i32 to vector<1x128xi32>
    %4 = arith.remsi %0, %3 : vector<1x128xi32>
    %c0_i32_0 = arith.constant 0 : i32
    %5 = vector.broadcast %c0_i32_0 : i32 to vector<1x128xi32>
    %6 = arith.cmpi ne, %4, %5 : vector<1x128xi32>
    %c0_i32_1 = arith.constant 0 : i32
    %7 = vector.broadcast %c0_i32_1 : i32 to vector<1x128xi32>
    %8 = arith.cmpi slt, %4, %7 : vector<1x128xi32>
    %c0_i32_2 = arith.constant 0 : i32
    %9 = arith.cmpi slt, %2, %c0_i32_2 : i32
    %10 = vector.broadcast %9 : i1 to vector<1x128xi1>
    %11 = vector.broadcast %10 : vector<1x128xi1> to vector<1x128xi1>
    %12 = arith.xori %8, %11 : vector<1x128xi1>
    %13 = arith.andi %12, %6 : vector<1x128xi1>
    %14 = vector.broadcast %2 : i32 to vector<1x128xi32>
    %15 = arith.addi %4, %14 : vector<1x128xi32>
    %16 = arith.select %13, %15, %4 : vector<1x128xi1>, vector<1x128xi32>
    %c0_i32_3 = arith.constant 0 : i32
    %17 = vector.broadcast %c0_i32_3 : i32 to vector<1x128xi32>
    %18 = arith.cmpi ne, %16, %17 : vector<1x128xi32>
    %19 = arith.extui %18 : vector<1x128xi1> to vector<1x128xi32>
    %20 = arith.sitofp %19 : vector<1x128xi32> to vector<1x128xf32>
    %c15_i32 = arith.constant 15 : i32
    %21 = vector.broadcast %c15_i32 : i32 to vector<1x128xi32>
    %22 = arith.cmpi ne, %16, %21 : vector<1x128xi32>
    %23 = arith.extui %22 : vector<1x128xi1> to vector<1x128xi32>
    %24 = arith.sitofp %23 : vector<1x128xi32> to vector<1x128xf32>
    %25 = vector.shape_cast %20 : vector<1x128xf32> to vector<1x128xf32>
    %26 = vector.broadcast %25 : vector<1x128xf32> to vector<32x128xf32>
    %27 = vector.shape_cast %24 : vector<1x128xf32> to vector<1x128xf32>
    %28 = vector.broadcast %27 : vector<1x128xf32> to vector<32x128xf32>
    %29 = vector.extract_strided_slice %26 {offsets = [0, 0], sizes = [16, 128], strides = [1, 1]} : vector<32x128xf32> to vector<16x128xf32>
    %30 = vector.extract_strided_slice %28 {offsets = [0, 0], sizes = [16, 128], strides = [1, 1]} : vector<32x128xf32> to vector<16x128xf32>
    %c0 = arith.constant 0 : index
    %c0_4 = arith.constant 0 : index
    %31 = vector.load %arg1[%c0, %c0_4] : memref<1x128xf32, #tpu.memory_space<vmem>>, vector<1x128xf32>
    %c1_i32_5 = arith.constant 1 : i32
    %32 = tpu.dynamic_rotate %31 by %c1_i32_5 dim 1 : vector<1x128xf32>, i32 -> vector<1x128xf32>
    %33 = arith.mulf %32, %20 : vector<1x128xf32>
    %c127_i32 = arith.constant 127 : i32
    %34 = tpu.dynamic_rotate %31 by %c127_i32 dim 1 : vector<1x128xf32>, i32 -> vector<1x128xf32>
    %35 = arith.mulf %34, %24 : vector<1x128xf32>
    %c0_6 = arith.constant 0 : index
    %c0_7 = arith.constant 0 : index
    %36 = vector.load %arg2[%c0_6, %c0_7] : memref<32x3xf32, #tpu.memory_space<vmem>>, vector<32x3xf32>
    %37 = vector.extract_strided_slice %36 {offsets = [0, 0], sizes = [32, 1], strides = [1, 1]} : vector<32x3xf32> to vector<32x1xf32>
    %38 = vector.broadcast %37 : vector<32x1xf32> to vector<32x128xf32>
    %39 = vector.broadcast %33 : vector<1x128xf32> to vector<32x128xf32>
    %40 = arith.mulf %38, %39 : vector<32x128xf32>
    %41 = vector.extract_strided_slice %36 {offsets = [0, 1], sizes = [32, 1], strides = [1, 1]} : vector<32x3xf32> to vector<32x1xf32>
    %42 = vector.broadcast %41 : vector<32x1xf32> to vector<32x128xf32>
    %43 = vector.broadcast %31 : vector<1x128xf32> to vector<32x128xf32>
    %44 = arith.mulf %42, %43 : vector<32x128xf32>
    %45 = arith.addf %40, %44 : vector<32x128xf32>
    %46 = vector.extract_strided_slice %36 {offsets = [0, 2], sizes = [32, 1], strides = [1, 1]} : vector<32x3xf32> to vector<32x1xf32>
    %47 = vector.broadcast %46 : vector<32x1xf32> to vector<32x128xf32>
    %48 = vector.broadcast %35 : vector<1x128xf32> to vector<32x128xf32>
    %49 = arith.mulf %47, %48 : vector<32x128xf32>
    %50 = arith.addf %45, %49 : vector<32x128xf32>
    %cst = arith.constant 0.000000e+00 : f32
    %51 = vector.broadcast %cst : f32 to vector<32x128xf32>
    %52 = arith.maximumf %50, %51 : vector<32x128xf32>
    %c0_8 = arith.constant 0 : index
    %c0_9 = arith.constant 0 : index
    %c0_10 = arith.constant 0 : index
    %c0_11 = arith.constant 0 : index
    %53 = vector.load %arg3[%c0_8, %c0_9, %c0_10, %c0_11] : memref<2x2x32x96xf32, #tpu.memory_space<vmem>>, vector<1x1x32x96xf32>
    %54 = vector.shape_cast %53 : vector<1x1x32x96xf32> to vector<32x96xf32>
    %c0_12 = arith.constant 0 : index
    %c1 = arith.constant 1 : index
    %c0_13 = arith.constant 0 : index
    %c0_14 = arith.constant 0 : index
    %55 = vector.load %arg3[%c0_12, %c1, %c0_13, %c0_14] : memref<2x2x32x96xf32, #tpu.memory_space<vmem>>, vector<1x1x32x96xf32>
    %56 = vector.shape_cast %55 : vector<1x1x32x96xf32> to vector<32x96xf32>
    %c1_15 = arith.constant 1 : index
    %c0_16 = arith.constant 0 : index
    %c0_17 = arith.constant 0 : index
    %c0_18 = arith.constant 0 : index
    %57 = vector.load %arg3[%c1_15, %c0_16, %c0_17, %c0_18] : memref<2x2x32x96xf32, #tpu.memory_space<vmem>>, vector<1x1x32x96xf32>
    %58 = vector.shape_cast %57 : vector<1x1x32x96xf32> to vector<32x96xf32>
    %c1_19 = arith.constant 1 : index
    %c1_20 = arith.constant 1 : index
    %c0_21 = arith.constant 0 : index
    %c0_22 = arith.constant 0 : index
    %59 = vector.load %arg3[%c1_19, %c1_20, %c0_21, %c0_22] : memref<2x2x32x96xf32, #tpu.memory_space<vmem>>, vector<1x1x32x96xf32>
    %60 = vector.shape_cast %59 : vector<1x1x32x96xf32> to vector<32x96xf32>
    %c1_i32_23 = arith.constant 1 : i32
    %61 = tpu.dynamic_rotate %52 by %c1_i32_23 dim 1 : vector<32x128xf32>, i32 -> vector<32x128xf32>
    %62 = arith.mulf %61, %26 : vector<32x128xf32>
    %c127_i32_24 = arith.constant 127 : i32
    %63 = tpu.dynamic_rotate %52 by %c127_i32_24 dim 1 : vector<32x128xf32>, i32 -> vector<32x128xf32>
    %64 = arith.mulf %63, %28 : vector<32x128xf32>
    %65 = tpu.concatenate %62, %52, %64 in 0 : vector<32x128xf32>, vector<32x128xf32>, vector<32x128xf32> -> vector<96x128xf32>
    %cst_25 = arith.constant dense<0.000000e+00> : vector<32x128xf32>
    %66 = tpu.matmul %54, %65, %cst_25 {dimension_numbers = #tpu.dot_dimension_numbers<[1], [0], [0], [1], [0, 0, 1, 1], [], []>} : vector<32x96xf32>, vector<96x128xf32>, vector<32x128xf32> -> vector<32x128xf32>
    %cst_26 = arith.constant 0.000000e+00 : f32
    %67 = vector.broadcast %cst_26 : f32 to vector<32x128xf32>
    %68 = arith.maximumf %66, %67 : vector<32x128xf32>
    %c1_i32_27 = arith.constant 1 : i32
    %69 = tpu.dynamic_rotate %68 by %c1_i32_27 dim 1 : vector<32x128xf32>, i32 -> vector<32x128xf32>
    %70 = arith.mulf %69, %26 : vector<32x128xf32>
    %c127_i32_28 = arith.constant 127 : i32
    %71 = tpu.dynamic_rotate %68 by %c127_i32_28 dim 1 : vector<32x128xf32>, i32 -> vector<32x128xf32>
    %72 = arith.mulf %71, %28 : vector<32x128xf32>
    %73 = tpu.concatenate %70, %68, %72 in 0 : vector<32x128xf32>, vector<32x128xf32>, vector<32x128xf32> -> vector<96x128xf32>
    %cst_29 = arith.constant dense<0.000000e+00> : vector<32x128xf32>
    %74 = tpu.matmul %56, %73, %cst_29 {dimension_numbers = #tpu.dot_dimension_numbers<[1], [0], [0], [1], [0, 0, 1, 1], [], []>} : vector<32x96xf32>, vector<96x128xf32>, vector<32x128xf32> -> vector<32x128xf32>
    %75 = arith.addf %74, %52 : vector<32x128xf32>
    %cst_30 = arith.constant 0.000000e+00 : f32
    %76 = vector.broadcast %cst_30 : f32 to vector<32x128xf32>
    %77 = arith.maximumf %75, %76 : vector<32x128xf32>
    %c1_i32_31 = arith.constant 1 : i32
    %78 = tpu.dynamic_rotate %77 by %c1_i32_31 dim 1 : vector<32x128xf32>, i32 -> vector<32x128xf32>
    %79 = arith.mulf %78, %26 : vector<32x128xf32>
    %c127_i32_32 = arith.constant 127 : i32
    %80 = tpu.dynamic_rotate %77 by %c127_i32_32 dim 1 : vector<32x128xf32>, i32 -> vector<32x128xf32>
    %81 = arith.mulf %80, %28 : vector<32x128xf32>
    %82 = tpu.concatenate %79, %77, %81 in 0 : vector<32x128xf32>, vector<32x128xf32>, vector<32x128xf32> -> vector<96x128xf32>
    %cst_33 = arith.constant dense<0.000000e+00> : vector<32x128xf32>
    %83 = tpu.matmul %58, %82, %cst_33 {dimension_numbers = #tpu.dot_dimension_numbers<[1], [0], [0], [1], [0, 0, 1, 1], [], []>} : vector<32x96xf32>, vector<96x128xf32>, vector<32x128xf32> -> vector<32x128xf32>
    %cst_34 = arith.constant 0.000000e+00 : f32
    %84 = vector.broadcast %cst_34 : f32 to vector<32x128xf32>
    %85 = arith.maximumf %83, %84 : vector<32x128xf32>
    %c1_i32_35 = arith.constant 1 : i32
    %86 = tpu.dynamic_rotate %85 by %c1_i32_35 dim 1 : vector<32x128xf32>, i32 -> vector<32x128xf32>
    %87 = arith.mulf %86, %26 : vector<32x128xf32>
    %c127_i32_36 = arith.constant 127 : i32
    %88 = tpu.dynamic_rotate %85 by %c127_i32_36 dim 1 : vector<32x128xf32>, i32 -> vector<32x128xf32>
    %89 = arith.mulf %88, %28 : vector<32x128xf32>
    %90 = tpu.concatenate %87, %85, %89 in 0 : vector<32x128xf32>, vector<32x128xf32>, vector<32x128xf32> -> vector<96x128xf32>
    %cst_37 = arith.constant dense<0.000000e+00> : vector<32x128xf32>
    %91 = tpu.matmul %60, %90, %cst_37 {dimension_numbers = #tpu.dot_dimension_numbers<[1], [0], [0], [1], [0, 0, 1, 1], [], []>} : vector<32x96xf32>, vector<96x128xf32>, vector<32x128xf32> -> vector<32x128xf32>
    %92 = arith.addf %91, %77 : vector<32x128xf32>
    %cst_38 = arith.constant 0.000000e+00 : f32
    %93 = vector.broadcast %cst_38 : f32 to vector<32x128xf32>
    %94 = arith.maximumf %92, %93 : vector<32x128xf32>
    %c1_i32_39 = arith.constant 1 : i32
    %95 = tpu.dynamic_rotate %94 by %c1_i32_39 dim 1 : vector<32x128xf32>, i32 -> vector<32x128xf32>
    %96 = arith.mulf %95, %26 : vector<32x128xf32>
    %c127_i32_40 = arith.constant 127 : i32
    %97 = tpu.dynamic_rotate %94 by %c127_i32_40 dim 1 : vector<32x128xf32>, i32 -> vector<32x128xf32>
    %98 = arith.mulf %97, %28 : vector<32x128xf32>
    %99 = tpu.concatenate %96, %94, %98 in 0 : vector<32x128xf32>, vector<32x128xf32>, vector<32x128xf32> -> vector<96x128xf32>
    %cst_41 = arith.constant dense<0.000000e+00> : vector<32x128xf32>
    %100 = tpu.matmul %54, %99, %cst_41 {dimension_numbers = #tpu.dot_dimension_numbers<[1], [0], [0], [1], [0, 0, 1, 1], [], []>} : vector<32x96xf32>, vector<96x128xf32>, vector<32x128xf32> -> vector<32x128xf32>
    %cst_42 = arith.constant 0.000000e+00 : f32
    %101 = vector.broadcast %cst_42 : f32 to vector<32x128xf32>
    %102 = arith.maximumf %100, %101 : vector<32x128xf32>
    %c1_i32_43 = arith.constant 1 : i32
    %103 = tpu.dynamic_rotate %102 by %c1_i32_43 dim 1 : vector<32x128xf32>, i32 -> vector<32x128xf32>
    %104 = arith.mulf %103, %26 : vector<32x128xf32>
    %c127_i32_44 = arith.constant 127 : i32
    %105 = tpu.dynamic_rotate %102 by %c127_i32_44 dim 1 : vector<32x128xf32>, i32 -> vector<32x128xf32>
    %106 = arith.mulf %105, %28 : vector<32x128xf32>
    %107 = tpu.concatenate %104, %102, %106 in 0 : vector<32x128xf32>, vector<32x128xf32>, vector<32x128xf32> -> vector<96x128xf32>
    %cst_45 = arith.constant dense<0.000000e+00> : vector<32x128xf32>
    %108 = tpu.matmul %56, %107, %cst_45 {dimension_numbers = #tpu.dot_dimension_numbers<[1], [0], [0], [1], [0, 0, 1, 1], [], []>} : vector<32x96xf32>, vector<96x128xf32>, vector<32x128xf32> -> vector<32x128xf32>
    %109 = arith.addf %108, %94 : vector<32x128xf32>
    %cst_46 = arith.constant 0.000000e+00 : f32
    %110 = vector.broadcast %cst_46 : f32 to vector<32x128xf32>
    %111 = arith.maximumf %109, %110 : vector<32x128xf32>
    %c1_i32_47 = arith.constant 1 : i32
    %112 = tpu.dynamic_rotate %111 by %c1_i32_47 dim 1 : vector<32x128xf32>, i32 -> vector<32x128xf32>
    %113 = arith.mulf %112, %26 : vector<32x128xf32>
    %c127_i32_48 = arith.constant 127 : i32
    %114 = tpu.dynamic_rotate %111 by %c127_i32_48 dim 1 : vector<32x128xf32>, i32 -> vector<32x128xf32>
    %115 = arith.mulf %114, %28 : vector<32x128xf32>
    %116 = tpu.concatenate %113, %111, %115 in 0 : vector<32x128xf32>, vector<32x128xf32>, vector<32x128xf32> -> vector<96x128xf32>
    %cst_49 = arith.constant dense<0.000000e+00> : vector<32x128xf32>
    %117 = tpu.matmul %58, %116, %cst_49 {dimension_numbers = #tpu.dot_dimension_numbers<[1], [0], [0], [1], [0, 0, 1, 1], [], []>} : vector<32x96xf32>, vector<96x128xf32>, vector<32x128xf32> -> vector<32x128xf32>
    %cst_50 = arith.constant 0.000000e+00 : f32
    %118 = vector.broadcast %cst_50 : f32 to vector<32x128xf32>
    %119 = arith.maximumf %117, %118 : vector<32x128xf32>
    %c1_i32_51 = arith.constant 1 : i32
    %120 = tpu.dynamic_rotate %119 by %c1_i32_51 dim 1 : vector<32x128xf32>, i32 -> vector<32x128xf32>
    %121 = arith.mulf %120, %26 : vector<32x128xf32>
    %c127_i32_52 = arith.constant 127 : i32
    %122 = tpu.dynamic_rotate %119 by %c127_i32_52 dim 1 : vector<32x128xf32>, i32 -> vector<32x128xf32>
    %123 = arith.mulf %122, %28 : vector<32x128xf32>
    %124 = tpu.concatenate %121, %119, %123 in 0 : vector<32x128xf32>, vector<32x128xf32>, vector<32x128xf32> -> vector<96x128xf32>
    %cst_53 = arith.constant dense<0.000000e+00> : vector<32x128xf32>
    %125 = tpu.matmul %60, %124, %cst_53 {dimension_numbers = #tpu.dot_dimension_numbers<[1], [0], [0], [1], [0, 0, 1, 1], [], []>} : vector<32x96xf32>, vector<96x128xf32>, vector<32x128xf32> -> vector<32x128xf32>
    %126 = arith.addf %125, %111 : vector<32x128xf32>
    %cst_54 = arith.constant 0.000000e+00 : f32
    %127 = vector.broadcast %cst_54 : f32 to vector<32x128xf32>
    %128 = arith.maximumf %126, %127 : vector<32x128xf32>
    %c0_55 = arith.constant 0 : index
    %c0_56 = arith.constant 0 : index
    %129 = vector.load %arg4[%c0_55, %c0_56] : memref<32x96xf32, #tpu.memory_space<vmem>>, vector<32x96xf32>
    %c1_i32_57 = arith.constant 1 : i32
    %130 = tpu.dynamic_rotate %128 by %c1_i32_57 dim 1 : vector<32x128xf32>, i32 -> vector<32x128xf32>
    %131 = arith.mulf %130, %26 : vector<32x128xf32>
    %c127_i32_58 = arith.constant 127 : i32
    %132 = tpu.dynamic_rotate %128 by %c127_i32_58 dim 1 : vector<32x128xf32>, i32 -> vector<32x128xf32>
    %133 = arith.mulf %132, %28 : vector<32x128xf32>
    %134 = tpu.concatenate %131, %128, %133 in 0 : vector<32x128xf32>, vector<32x128xf32>, vector<32x128xf32> -> vector<96x128xf32>
    %cst_59 = arith.constant dense<0.000000e+00> : vector<32x128xf32>
    %135 = tpu.matmul %129, %134, %cst_59 {dimension_numbers = #tpu.dot_dimension_numbers<[1], [0], [0], [1], [0, 0, 1, 1], [], []>} : vector<32x96xf32>, vector<96x128xf32>, vector<32x128xf32> -> vector<32x128xf32>
    %cst_60 = arith.constant 0.000000e+00 : f32
    %136 = vector.broadcast %cst_60 : f32 to vector<32x128xf32>
    %137 = arith.maximumf %135, %136 : vector<32x128xf32>
    %c0_61 = arith.constant 0 : index
    %c0_62 = arith.constant 0 : index
    %138 = vector.load %arg5[%c0_61, %c0_62] : memref<16x96xf32, #tpu.memory_space<vmem>>, vector<16x96xf32>
    %c1_i32_63 = arith.constant 1 : i32
    %139 = tpu.dynamic_rotate %137 by %c1_i32_63 dim 1 : vector<32x128xf32>, i32 -> vector<32x128xf32>
    %140 = arith.mulf %139, %26 : vector<32x128xf32>
    %c127_i32_64 = arith.constant 127 : i32
    %141 = tpu.dynamic_rotate %137 by %c127_i32_64 dim 1 : vector<32x128xf32>, i32 -> vector<32x128xf32>
    %142 = arith.mulf %141, %28 : vector<32x128xf32>
    %143 = tpu.concatenate %140, %137, %142 in 0 : vector<32x128xf32>, vector<32x128xf32>, vector<32x128xf32> -> vector<96x128xf32>
    %cst_65 = arith.constant dense<0.000000e+00> : vector<16x128xf32>
    %144 = tpu.matmul %138, %143, %cst_65 {dimension_numbers = #tpu.dot_dimension_numbers<[1], [0], [0], [1], [0, 0, 1, 1], [], []>} : vector<16x96xf32>, vector<96x128xf32>, vector<16x128xf32> -> vector<16x128xf32>
    %cst_66 = arith.constant 0.000000e+00 : f32
    %145 = vector.broadcast %cst_66 : f32 to vector<16x128xf32>
    %146 = arith.maximumf %144, %145 : vector<16x128xf32>
    %c0_67 = arith.constant 0 : index
    %c0_68 = arith.constant 0 : index
    %147 = vector.load %arg6[%c0_67, %c0_68] : memref<2x48xf32, #tpu.memory_space<vmem>>, vector<2x48xf32>
    %c1_i32_69 = arith.constant 1 : i32
    %148 = tpu.dynamic_rotate %146 by %c1_i32_69 dim 1 : vector<16x128xf32>, i32 -> vector<16x128xf32>
    %149 = arith.mulf %148, %29 : vector<16x128xf32>
    %c127_i32_70 = arith.constant 127 : i32
    %150 = tpu.dynamic_rotate %146 by %c127_i32_70 dim 1 : vector<16x128xf32>, i32 -> vector<16x128xf32>
    %151 = arith.mulf %150, %30 : vector<16x128xf32>
    %152 = tpu.concatenate %149, %146, %151 in 0 : vector<16x128xf32>, vector<16x128xf32>, vector<16x128xf32> -> vector<48x128xf32>
    %cst_71 = arith.constant dense<0.000000e+00> : vector<2x128xf32>
    %153 = tpu.matmul %147, %152, %cst_71 {dimension_numbers = #tpu.dot_dimension_numbers<[1], [0], [0], [1], [0, 0, 1, 1], [], []>} : vector<2x48xf32>, vector<48x128xf32>, vector<2x128xf32> -> vector<2x128xf32>
    %c0_72 = arith.constant 0 : index
    %c0_73 = arith.constant 0 : index
    %154 = vector.load %arg7[%c0_72, %c0_73] : memref<2x128xf32, #tpu.memory_space<vmem>>, vector<2x128xf32>
    tpu.vector_store %arg7[%c0_72, %c0_73], %153 {strides = array<i32>} : memref<2x128xf32, #tpu.memory_space<vmem>>, vector<2x128xf32>,
    return
  }
  func.func @transform_0(%arg0: i32) -> (i32, i32) {
    %c0_i32 = arith.constant 0 : i32
    %c0_i32_0 = arith.constant 0 : i32
    return %c0_i32, %arg0 : i32, i32
  }
  func.func @transform_1(%arg0: i32) -> (i32, i32) {
    %c0_i32 = arith.constant 0 : i32
    %c0_i32_0 = arith.constant 0 : i32
    %c0_i32_1 = arith.constant 0 : i32
    return %c0_i32, %c0_i32_0 : i32, i32
  }
  func.func @transform_2(%arg0: i32) -> (i32, i32, i32, i32) {
    %c0_i32 = arith.constant 0 : i32
    %c0_i32_0 = arith.constant 0 : i32
    %c0_i32_1 = arith.constant 0 : i32
    %c0_i32_2 = arith.constant 0 : i32
    %c0_i32_3 = arith.constant 0 : i32
    return %c0_i32, %c0_i32_0, %c0_i32_1, %c0_i32_2 : i32, i32, i32, i32
  }
  func.func @transform_3(%arg0: i32) -> (i32, i32) {
    %c0_i32 = arith.constant 0 : i32
    %c0_i32_0 = arith.constant 0 : i32
    %c0_i32_1 = arith.constant 0 : i32
    return %c0_i32, %c0_i32_0 : i32, i32
  }
  func.func @transform_4(%arg0: i32) -> (i32, i32) {
    %c0_i32 = arith.constant 0 : i32
    %c0_i32_0 = arith.constant 0 : i32
    %c0_i32_1 = arith.constant 0 : i32
    return %c0_i32, %c0_i32_0 : i32, i32
  }
  func.func @transform_5(%arg0: i32) -> (i32, i32) {
    %c0_i32 = arith.constant 0 : i32
    %c0_i32_0 = arith.constant 0 : i32
    %c0_i32_1 = arith.constant 0 : i32
    return %c0_i32, %c0_i32_0 : i32, i32
  }
  func.func @transform_6(%arg0: i32) -> (i32, i32) {
    %c0_i32 = arith.constant 0 : i32
    %c0_i32_0 = arith.constant 0 : i32
    return %c0_i32, %arg0 : i32, i32
  }
}

</mosaic_0001>

<bundles_post_ra>
// kernel: tpu_custom_call.1
= control target key start
LH: loop header
LB: loop body
LE: loop exit
PB: predicated region body
PF: predicated region fallthrough
CT: control target
= control target key end

     0   :  { %11 = vsyncpa [#allocation3], 0  ;;  %s1494_s0 = inlined_call_operand.vmem [shape: f32[1,128], index: 0, kind: input, shape index: {}]   ;;  %s1495_s1 = inlined_call_operand.vmem [shape: f32[32,3], index: 1, kind: input, shape index: {}]   ;;  %s1496_s2 = inlined_call_operand.hbm [shape: f32[2,2,32,96], index: 2, kind: input, shape index: {}]   ;;  %s1497_s3 = inlined_call_operand.vmem [shape: f32[32,96], index: 3, kind: input, shape index: {}]   ;;  %s1498_s4 = inlined_call_operand.hbm [shape: f32[16,96], index: 4, kind: input, shape index: {}]   ;;  %s1499_s5 = inlined_call_operand.vmem [shape: f32[2,48], index: 5, kind: input, shape index: {}]   ;;  %s1500_s6 = inlined_call_operand.hbm [shape: f32[2,128], index: 6, kind: output, shape index: {}]  }
   0x1   :  { %12 = vsyncpa [#allocation6], 0 }
   0x2   :  { %13 = vsyncpa [#allocation4], 0  ;;  %s22_s23 = sshll.u32 %s1496_s2, 4  ;;  %s1032_s24 = smov [#allocation2]   ;;  %s23_s23 = int_to_ptr.hbm [resolvable:$true] %s22_s23 }
   0x3   :  { %s24_s25 = sshll.u32 %s1032_s24, 4  ;;  %s37_s28 = sshll.u32 %s1498_s4, 4  ;;  %s25_s25 = int_to_ptr.vmem [resolvable:$true] %s24_s25  ;;  %s38_s28 = int_to_ptr.hbm [resolvable:$true] %s37_s28 }
   0x4   :  { %s1033_s29 = smov 128   ;;  %s1034_s30 = smov 8  }
   0x5   :  { %30 = dma.hbm_to_vmem [thread:$0]  %s23_s23, 2048, %s25_s25, [#allocation3], %s1033_s29, %s1033_s29, %s1034_s30  }
   0x6   :  { %s1035_s7 = smov [#allocation5]  }
   0x7   :  { %s39_s8 = sshll.u32 %s1035_s7, 4  ;;  %s40_s8 = int_to_ptr.vmem [resolvable:$true] %s39_s8 }
   0x8   :  { %45 = dma.hbm_to_vmem [thread:$0]  %s38_s28, 256, %s40_s8, [#allocation6], %s1033_s29, %s1033_s29, %s1034_s30  }
   0x9   :  { %1026 = dma.done.wait [#allocation3], 2048  }
   0xa   :  { %1027 = vsyncadd [#allocation3], 4294965248 }
   0xb   :  { %1028 = dma.done.wait [#allocation6], 256  }
   0xc   :  { %1029 = vsyncadd [#allocation6], 4294967040  ;;  %v1036_v0 = vmov 0   ;;  %v1037_v1 = vmov 2   ;;  %v86_v2 = vld [vmem:[%s1495_s1 + $0x18] sm:$0xff]  ;;  %s1038_s11 = smov 1   ;;  %v56_v9 = vlaneseq }
   0xd   :  { %942 = vset.pattern.permute.xlu1 %v1036_v0  ;;  %944 = vset.pattern.permute.xlu2 %v1036_v0  ;;  %v76_v3 = vld [vmem:[%s1494_s0] sm:$0x1]  ;;  %v85_v4 = vld [vmem:[%s1495_s1 + $0x10] sm:$0xff]  ;;  %v1039_v5 = vmov 1   ;;  %s1040_s14 = smov 127   ;;  %v84_v6 = vld [vmem:[%s1495_s1 + $0x8] sm:$0xff] }
   0xe   :  { %946 = vset.pattern.permute.xlu0 %v1037_v1  ;;  %104 = vperm.xlu1 %942, %v86_v2   ;;  %v83_v7 = vld [vmem:[%s1495_s1] sm:$0xff]  ;;  %v57_v10 = vand.u32 127, %v56_v9  ;;  %v1041_v15 = vmov 0.0   ;;  %vm211_vm2 = vcmask 785408   ;;  %vm835_vm3 = vcmask 392192   ;;  %s1042_s28 = smov [#allocation7]  }
   0xf   :  { %77 = vrot.lane.b32.xlu0 %v76_v3, %s1038_s11  ;;  %99 = vperm.xlu2 %944, %v85_v4   ;;  %v953_v23 = vld [vmem:[%s1494_s0] ss:$0 sm:$0xff]  ;;  %s865_s29 = sshll.u32 %s1042_s28, 4  ;;  %s867_s8 = sshll.u32 %s1500_s6, 4  ;;  %s866_s29 = int_to_ptr.vmem [resolvable:$true] %s865_s29  ;;  %s868_s8 = int_to_ptr.hbm [resolvable:$true] %s867_s8 }
  0x10   :  { %v62_v12 = vand.u32 15, %v57_v10  ;;  %v1146_v9 = vld [vmem:[#allocation2] sm:$0xff]  ;;  %v1150_v10 = vld [vmem:[#allocation2 + $0x8] sm:$0xff] }
  0x12   :  { %vm70_vm0 = vcmp.ne.s32.totalorder %v62_v12, 0  ;;  %vm73_vm1 = vcmp.ne.s32.totalorder %v62_v12, 15  ;;  %v1158_v12 = vld [vmem:[#allocation2 + $0x18] sm:$0xff] }
  0x13   :  { %v1101_v16 = vsel %vm70_vm0, 1.0, %v1041_v15  ;;  %v1103_v18 = vsel %vm73_vm1, 1.0, %v1041_v15 }
  0x16   :  { %943 = vset.pattern.permute.xlu1 %v1039_v5 }
  0x17   :  { %80 = vrot.lane.b32.xlu0 %v76_v3, %s1040_s14  ;;  %125 = vperm.xlu1 %943, %v86_v2  }
  0x18   :  { %945 = vset.pattern.permute.xlu2 %v1039_v5 }
  0x19   :  { %121 = vperm.xlu2 %945, %v85_v4  }
  0x1f   :  { %152 = vperm.xlu0 %946, %v86_v2   ;;  %947 = vset.pattern.permute.xlu1 %v1036_v0 }
  0x20   :  { %94 = vperm.xlu1 %947, %v84_v6  }
  0x21   :  { %117 = vperm.xlu2 %945, %v84_v6  }
  0x27   :  { %950 = vset.pattern.permute.xlu0 %v1039_v5 }
  0x28   :  { %113 = vperm.xlu0 %950, %v83_v7   ;;  %948 = vset.pattern.permute.xlu1 %v1037_v1 }
  0x29   :  { %949 = vset.pattern.permute.xlu2 %v1036_v0  ;;  %148 = vperm.xlu1 %948, %v85_v4  }
  0x2a   :  { %89 = vperm.xlu2 %949, %v83_v7  }
  0x30   :  { %952 = vset.pattern.permute.xlu0 %v1037_v1 }
  0x31   :  { %144 = vperm.xlu1 %948, %v84_v6  }
  0x32   :  { %951 = vset.pattern.permute.xlu2 %v1037_v1 }
  0x33   :  { %140 = vperm.xlu2 %951, %v83_v7  }
  0x69   :  { %v100_v8 = vpop.permute.xlu2 %99 }
  0x73   :  { %v122_v11 = vpop.permute.xlu2 %121 }
  0x74   :  { %v133_v35 = vmul.f32 %v953_v23, %v122_v11  ;;  %v1154_v11 = vld [vmem:[#allocation2 + $0x10] sm:$0xff] }
  0x7b   :  { %v118_v17 = vpop.permute.xlu2 %117 }
  0x7c   :  { %v132_v51 = vmul.f32 %v953_v23, %v118_v17 }
  0x80   :  { %v105_v13 = vpop.permute.xlu1 %104 }
  0x81   :  { %v78_v14 = vpop.permute.xlu0 %77 }
  0x82   :  { %v79_v19 = vmul.f32 %v1101_v16, %v78_v14 }
  0x84   :  { %v107_v24 = vperm.slane %v79_v19, 0  ;;  %v90_v28 = vpop.permute.xlu2 %89 }
  0x86   :  { %v111_v27 = vmul.f32 %v107_v24, %v105_v13  ;;  %v110_v36 = vmul.f32 %v107_v24, %v100_v8  ;;  %v108_v39 = vmul.f32 %v107_v24, %v90_v28 }
  0x88   :  { %v137_v44 = vadd.f32 %v133_v35, %v110_v36 }
  0x89   :  { %v81_v20 = vpop.permute.xlu0 %80  ;;  %v126_v22 = vpop.permute.xlu1 %125 }
  0x8a   :  { %v82_v21 = vmul.f32 %v1103_v18, %v81_v20  ;;  %v134_v26 = vmul.f32 %v953_v23, %v126_v22 }
  0x8c   :  { %v155_v25 = vperm.slane %v82_v21, 0  ;;  %v138_v30 = vadd.f32 %v134_v26, %v111_v27 }
  0x8d   :  { %v141_v37 = vpop.permute.xlu2 %140 }
  0x8e   :  { %v156_v42 = vmul.f32 %v155_v25, %v141_v37 }
  0x91   :  { %v153_v29 = vpop.permute.xlu0 %152 }
  0x92   :  { %v159_v31 = vmul.f32 %v155_v25, %v153_v29  ;;  %v95_v32 = vpop.permute.xlu1 %94 }
  0x93   :  { %v109_v48 = vmul.f32 %v107_v24, %v95_v32 }
  0x94   :  { %v163_v33 = vadd.f32 %v159_v31, %v138_v30 }
  0x95   :  { %v136_v53 = vadd.f32 %v132_v51, %v109_v48 }
  0x96   :  { %v1110_v34 = vmax.f32 %v163_v33, 0.0 }
  0x98   :  { %205 = vrot.lane.b32.xlu1 %v1110_v34, %s1040_s14 }
  0x9a   :  { %v114_v38 = vpop.permute.xlu0 %113 }
  0x9b   :  { %v131_v40 = vmul.f32 %v953_v23, %v114_v38  ;;  %v149_v41 = vpop.permute.xlu1 %148 }
  0x9c   :  { %v158_v45 = vmul.f32 %v155_v25, %v149_v41  ;;  %v1182_v41 = vld [vmem:[#allocation2 + $0x28] sm:$0xff] }
  0x9d   :  { %v135_v43 = vadd.f32 %v131_v40, %v108_v39  ;;  %v1178_v40 = vld [vmem:[#allocation2 + $0x20] sm:$0xff] }
  0x9e   :  { %v162_v47 = vadd.f32 %v158_v45, %v137_v44 }
  0x9f   :  { %v160_v46 = vadd.f32 %v156_v42, %v135_v43  ;;  %v1186_v42 = vld [vmem:[#allocation2 + $0x30] sm:$0xff]  ;;  %v1190_v43 = vld [vmem:[#allocation2 + $0x38] sm:$0xff] }
  0xa0   :  { %v1116_v50 = vmax.f32 %v162_v47, 0.0 }
  0xa1   :  { %v1114_v49 = vmax.f32 %v160_v46, 0.0 }
  0xa2   :  { %203 = vrot.lane.b32.xlu2 %v1116_v50, %s1040_s14 }
  0xa3   :  { %199 = vrot.lane.b32.xlu1 %v1114_v49, %s1040_s14  ;;  %v145_v52 = vpop.permute.xlu1 %144 }
  0xa4   :  { %v157_v54 = vmul.f32 %v155_v25, %v145_v52 }
  0xa6   :  { %v161_v55 = vadd.f32 %v157_v54, %v136_v53 }
  0xa8   :  { %v1122_v56 = vmax.f32 %v161_v55, 0.0 }
  0xaa   :  { %193 = vrot.lane.b32.xlu2 %v1110_v34, %s1038_s11  ;;  %201 = vrot.lane.b32.xlu0 %v1122_v56, %s1040_s14 }
  0xab   :  { %189 = vrot.lane.b32.xlu1 %v1122_v56, %s1038_s11 }
  0xb2   :  { %191 = vrot.lane.b32.xlu0 %v1116_v50, %s1038_s11  ;;  %187 = vrot.lane.b32.xlu2 %v1114_v49, %s1038_s11 }
  0xfc   :  { %v204_v57 = vpop.permute.xlu2 %203 }
  0xfd   :  { %v209_v60 = vmul.f32 %v1103_v18, %v204_v57 }
 0x104   :  { %v194_v1 = vpop.permute.xlu2 %193 }
 0x105   :  { %v198_v3 = vmul.f32 %v1101_v16, %v194_v1 }
 0x10a   :  { %v206_v58 = vpop.permute.xlu1 %205 }
 0x10b   :  { %v210_v59 = vmul.f32 %v1103_v18, %v206_v58 }
 0x10c   :  { %v188_v6 = vpop.permute.xlu2 %187 }
 0x10d   :  { %228 = vmatpush.msra.mxu0 %v210_v59  ;;  %v195_v8 = vmul.f32 %v1101_v16, %v188_v6 }
 0x10f   :  { %229 = vmatpush.msra.mxu0 %v209_v60 }
 0x115   :  { %v200_v61 = vpop.permute.xlu1 %199 }
 0x116   :  { %v207_v0 = vmul.f32 %v1103_v18, %v200_v61 }
 0x11c   :  { %v202_v62 = vpop.permute.xlu0 %201 }
 0x11d   :  { %v208_v63 = vmul.f32 %v1103_v18, %v202_v62  ;;  %v190_v4 = vpop.permute.xlu1 %189 }
 0x11e   :  { %v196_v7 = vmul.f32 %v1101_v16, %v190_v4 }
 0x11f   :  { %230 = vmatpush.msra.mxu0 %v208_v63 }
 0x121   :  { %231 = vmatpush.msra.mxu0 %v207_v0 }
 0x123   :  { %232 = vmatpush.msra.mxu0 %v1110_v34 }
 0x124   :  { %v192_v2 = vpop.permute.xlu0 %191 }
 0x125   :  { %233 = vmatpush.msra.mxu0 %v1116_v50  ;;  %v197_v5 = vmul.f32 %v1101_v16, %v192_v2 }
 0x127   :  { %234 = vmatpush.msra.mxu0 %v1122_v56 }
 0x129   :  { %235 = vmatpush.msra.mxu0 %v1114_v49 }
 0x12b   :  { %236 = vmatpush.msra.mxu0 %v198_v3 }
 0x12d   :  { %237 = vmatpush.msra.mxu0 %v197_v5 }
 0x12f   :  { %238 = vmatpush.msra.mxu0 %v196_v7  ;;  %v1234_v7 = vld [vmem:[#allocation2 + $0x40] sm:$0xff] }
 0x131   :  { %239 = vmatpush.msra.mxu0 %v195_v8  ;;  %v1238_v8 = vld [vmem:[#allocation2 + $0x48] sm:$0xff] }
 0x132   :  { %880 = vmatmul.msk.f32.vlgmr.msra.gmra.mxu0 %vm211_vm2, %v1146_v9 }
 0x13a   :  { %881 = vmatmul.msk.f32.gmra.mxu0 %vm211_vm2, %v1150_v10 }
 0x142   :  { %882 = vmatmul.msk.f32.gmra.mxu0 %vm211_vm2, %v1154_v11 }
 0x14a   :  { %883 = vmatmul.msk.f32.gmra.mxu0 %vm211_vm2, %v1158_v12 }
 0x1af   :  { %v241_v13 = vpop.f32.mrf.mxu0 }
 0x1b0   :  { %v253_v22 = vmax.f32 %v241_v13, 0.0  ;;  %v1242_v13 = vld [vmem:[#allocation2 + $0x50] sm:$0xff] }
 0x1b7   :  { %v244_v14 = vpop.f32.mrf.mxu0 }
 0x1b8   :  { %v254_v15 = vmax.f32 %v244_v14, 0.0  ;;  %v1246_v14 = vld [vmem:[#allocation2 + $0x58] sm:$0xff] }
 0x1ba   :  { %271 = vrot.lane.b32.xlu2 %v254_v15, %s1040_s14 }
 0x1bf   :  { %v247_v17 = vpop.f32.mrf.mxu0 }
 0x1c0   :  { %v255_v19 = vmax.f32 %v247_v17, 0.0 }
 0x1c2   :  { %261 = vrot.lane.b32.xlu2 %v255_v19, %s1038_s11  ;;  %273 = vrot.lane.b32.xlu1 %v255_v19, %s1040_s14 }
 0x1c7   :  { %v250_v20 = vpop.f32.mrf.mxu0 }
 0x1c8   :  { %v256_v21 = vmax.f32 %v250_v20, 0.0 }
 0x1ca   :  { %263 = vrot.lane.b32.xlu1 %v256_v21, %s1038_s11  ;;  %275 = vrot.lane.b32.xlu0 %v256_v21, %s1040_s14 }
 0x1d2   :  { %257 = vrot.lane.b32.xlu1 %v253_v22, %s1038_s11  ;;  %269 = vrot.lane.b32.xlu0 %v253_v22, %s1040_s14 }
 0x1da   :  { %259 = vrot.lane.b32.xlu0 %v254_v15, %s1038_s11 }
 0x214   :  { %v272_v26 = vpop.permute.xlu2 %271 }
 0x215   :  { %v278_v28 = vmul.f32 %v1103_v18, %v272_v26 }
 0x21c   :  { %v262_v32 = vpop.permute.xlu2 %261 }
 0x21d   :  { %v267_v36 = vmul.f32 %v1101_v16, %v262_v32 }
 0x234   :  { %v274_v23 = vpop.permute.xlu1 %273 }
 0x235   :  { %v279_v27 = vmul.f32 %v1103_v18, %v274_v23 }
 0x23c   :  { %v276_v24 = vpop.permute.xlu0 %275  ;;  %v264_v31 = vpop.permute.xlu1 %263 }
 0x23d   :  { %v280_v25 = vmul.f32 %v1103_v18, %v276_v24  ;;  %v268_v33 = vmul.f32 %v1101_v16, %v264_v31 }
 0x23f   :  { %297 = vmatpush.msra.mxu1 %v280_v25 }
 0x241   :  { %298 = vmatpush.msra.mxu1 %v279_v27 }
 0x243   :  { %299 = vmatpush.msra.mxu1 %v278_v28 }
 0x244   :  { %v270_v29 = vpop.permute.xlu0 %269  ;;  %v258_v37 = vpop.permute.xlu1 %257 }
 0x245   :  { %v277_v30 = vmul.f32 %v1103_v18, %v270_v29  ;;  %v265_v39 = vmul.f32 %v1101_v16, %v258_v37 }
 0x247   :  { %300 = vmatpush.msra.mxu1 %v277_v30 }
 0x249   :  { %301 = vmatpush.msra.mxu1 %v256_v21 }
 0x24b   :  { %302 = vmatpush.msra.mxu1 %v255_v19 }
 0x24c   :  { %v260_v35 = vpop.permute.xlu0 %259 }
 0x24d   :  { %303 = vmatpush.msra.mxu1 %v254_v15  ;;  %v266_v38 = vmul.f32 %v1101_v16, %v260_v35 }
 0x24f   :  { %304 = vmatpush.msra.mxu1 %v253_v22 }
 0x251   :  { %305 = vmatpush.msra.mxu1 %v268_v33 }
 0x253   :  { %306 = vmatpush.msra.mxu1 %v267_v36 }
 0x255   :  { %307 = vmatpush.msra.mxu1 %v266_v38 }
 0x257   :  { %308 = vmatpush.msra.mxu1 %v265_v39 }
 0x258   :  { %884 = vmatmul.msk.f32.vlgmr.msra.gmra.mxu1 %vm211_vm2, %v1178_v40 }
 0x260   :  { %885 = vmatmul.msk.f32.gmra.mxu1 %vm211_vm2, %v1182_v41 }
 0x268   :  { %886 = vmatmul.msk.f32.gmra.mxu1 %vm211_vm2, %v1186_v42 }
 0x270   :  { %887 = vmatmul.msk.f32.gmra.mxu1 %vm211_vm2, %v1190_v43 }
 0x2d5   :  { %v310_v44 = vpop.f32.mrf.mxu1 }
 0x2dd   :  { %v313_v45 = vpop.f32.mrf.mxu1 }
 0x2de   :  { %v314_v46 = vadd.f32 %v313_v45, %v1122_v56 }
 0x2e0   :  { %v1195_v47 = vmax.f32 %v314_v46, 0.0  ;;  %v1266_v46 = vld [vmem:[#allocation2 + $0x60] sm:$0xff] }
 0x2e2   :  { %340 = vrot.lane.b32.xlu1 %v1195_v47, %s1040_s14 }
 0x2e5   :  { %v316_v48 = vpop.f32.mrf.mxu1 }
 0x2e6   :  { %v317_v51 = vadd.f32 %v316_v48, %v1116_v50  ;;  %v311_v50 = vadd.f32 %v310_v44, %v1114_v49  ;;  %v1270_v48 = vld [vmem:[#allocation2 + $0x68] sm:$0xff] }
 0x2e8   :  { %v1200_v52 = vmax.f32 %v317_v51, 0.0  ;;  %v1214_v56 = vmax.f32 %v311_v50, 0.0  ;;  %v1274_v51 = vld [vmem:[#allocation2 + $0x70] sm:$0xff] }
 0x2ea   :  { %342 = vrot.lane.b32.xlu0 %v1200_v52, %s1040_s14  ;;  %330 = vrot.lane.b32.xlu1 %v1200_v52, %s1038_s11 }
 0x2ed   :  { %v319_v53 = vpop.f32.mrf.mxu1 }
 0x2ee   :  { %v320_v54 = vadd.f32 %v319_v53, %v1110_v34  ;;  %v1278_v53 = vld [vmem:[#allocation2 + $0x78] sm:$0xff] }
 0x2f0   :  { %v1207_v55 = vmax.f32 %v320_v54, 0.0 }
 0x2f2   :  { %344 = vrot.lane.b32.xlu2 %v1207_v55, %s1040_s14  ;;  %332 = vrot.lane.b32.xlu0 %v1207_v55, %s1038_s11 }
 0x2fa   :  { %326 = vrot.lane.b32.xlu0 %v1214_v56, %s1038_s11  ;;  %338 = vrot.lane.b32.xlu2 %v1214_v56, %s1040_s14 }
 0x302   :  { %328 = vrot.lane.b32.xlu2 %v1195_v47, %s1038_s11 }
 0x34c   :  { %v345_v34 = vpop.permute.xlu2 %344 }
 0x34d   :  { %v349_v57 = vmul.f32 %v1103_v18, %v345_v34 }
 0x34f   :  { %366 = vmatpush.msra.mxu2 %v349_v57 }
 0x354   :  { %v341_v58 = vpop.permute.xlu1 %340  ;;  %v339_v49 = vpop.permute.xlu2 %338 }
 0x355   :  { %v347_v61 = vmul.f32 %v1103_v18, %v341_v58  ;;  %v346_v62 = vmul.f32 %v1103_v18, %v339_v49 }
 0x35c   :  { %v343_v59 = vpop.permute.xlu0 %342  ;;  %v331_v0 = vpop.permute.xlu1 %330 }
 0x35d   :  { %v348_v60 = vmul.f32 %v1103_v18, %v343_v59  ;;  %v329_v2 = vpop.permute.xlu2 %328  ;;  %v336_v3 = vmul.f32 %v1101_v16, %v331_v0 }
 0x35e   :  { %v335_v5 = vmul.f32 %v1101_v16, %v329_v2 }
 0x35f   :  { %367 = vmatpush.msra.mxu2 %v348_v60 }
 0x361   :  { %368 = vmatpush.msra.mxu2 %v347_v61 }
 0x363   :  { %369 = vmatpush.msra.mxu2 %v346_v62 }
 0x364   :  { %v333_v63 = vpop.permute.xlu0 %332 }
 0x365   :  { %370 = vmatpush.msra.mxu2 %v1207_v55  ;;  %v337_v1 = vmul.f32 %v1101_v16, %v333_v63 }
 0x367   :  { %371 = vmatpush.msra.mxu2 %v1200_v52 }
 0x369   :  { %372 = vmatpush.msra.mxu2 %v1195_v47 }
 0x36b   :  { %373 = vmatpush.msra.mxu2 %v1214_v56 }
 0x36c   :  { %v327_v4 = vpop.permute.xlu0 %326 }
 0x36d   :  { %374 = vmatpush.msra.mxu2 %v337_v1  ;;  %v334_v6 = vmul.f32 %v1101_v16, %v327_v4 }
 0x36f   :  { %375 = vmatpush.msra.mxu2 %v336_v3 }
 0x371   :  { %376 = vmatpush.msra.mxu2 %v335_v5 }
 0x373   :  { %377 = vmatpush.msra.mxu2 %v334_v6 }
 0x374   :  { %888 = vmatmul.msk.f32.vlgmr.msra.gmra.mxu2 %vm211_vm2, %v1234_v7 }
 0x37c   :  { %889 = vmatmul.msk.f32.gmra.mxu2 %vm211_vm2, %v1238_v8 }
 0x384   :  { %890 = vmatmul.msk.f32.gmra.mxu2 %vm211_vm2, %v1242_v13 }
 0x38c   :  { %891 = vmatmul.msk.f32.gmra.mxu2 %vm211_vm2, %v1246_v14 }
 0x3f7   :  { %v379_v15 = vpop.f32.mrf.mxu2 }
 0x3f8   :  { %v391_v24 = vmax.f32 %v379_v15, 0.0 }
 0x3ff   :  { %v382_v17 = vpop.f32.mrf.mxu2 }
 0x400   :  { %v392_v19 = vmax.f32 %v382_v17, 0.0 }
 0x402   :  { %409 = vrot.lane.b32.xlu0 %v392_v19, %s1040_s14 }
 0x407   :  { %v385_v20 = vpop.f32.mrf.mxu2 }
 0x408   :  { %v393_v21 = vmax.f32 %v385_v20, 0.0 }
 0x40a   :  { %399 = vrot.lane.b32.xlu0 %v393_v21, %s1038_s11  ;;  %411 = vrot.lane.b32.xlu2 %v393_v21, %s1040_s14 }
 0x40f   :  { %v388_v22 = vpop.f32.mrf.mxu2 }
 0x410   :  { %v394_v23 = vmax.f32 %v388_v22, 0.0 }
 0x412   :  { %401 = vrot.lane.b32.xlu2 %v394_v23, %s1038_s11  ;;  %413 = vrot.lane.b32.xlu1 %v394_v23, %s1040_s14 }
 0x41a   :  { %395 = vrot.lane.b32.xlu2 %v391_v24, %s1038_s11  ;;  %407 = vrot.lane.b32.xlu1 %v391_v24, %s1040_s14 }
 0x422   :  { %397 = vrot.lane.b32.xlu1 %v392_v19, %s1038_s11 }
 0x464   :  { %v412_v25 = vpop.permute.xlu2 %411 }
 0x465   :  { %v417_v29 = vmul.f32 %v1103_v18, %v412_v25 }
 0x46c   :  { %v402_v33 = vpop.permute.xlu2 %401 }
 0x46d   :  { %v406_v36 = vmul.f32 %v1101_v16, %v402_v33 }
 0x474   :  { %v410_v28 = vpop.permute.xlu0 %409  ;;  %v396_v39 = vpop.permute.xlu2 %395 }
 0x475   :  { %v416_v30 = vmul.f32 %v1103_v18, %v410_v28  ;;  %v403_v45 = vmul.f32 %v1101_v16, %v396_v39 }
 0x47c   :  { %v400_v35 = vpop.permute.xlu0 %399 }
 0x47d   :  { %v405_v38 = vmul.f32 %v1101_v16, %v400_v35 }
 0x484   :  { %v414_v26 = vpop.permute.xlu1 %413 }
 0x485   :  { %v418_v27 = vmul.f32 %v1103_v18, %v414_v26 }
 0x487   :  { %435 = vmatpush.msra.mxu3 %v418_v27 }
 0x489   :  { %436 = vmatpush.msra.mxu3 %v417_v29 }
 0x48b   :  { %437 = vmatpush.msra.mxu3 %v416_v30 }
 0x48c   :  { %v408_v31 = vpop.permute.xlu1 %407 }
 0x48d   :  { %v415_v32 = vmul.f32 %v1103_v18, %v408_v31 }
 0x48f   :  { %438 = vmatpush.msra.mxu3 %v415_v32 }
 0x491   :  { %439 = vmatpush.msra.mxu3 %v394_v23 }
 0x493   :  { %440 = vmatpush.msra.mxu3 %v393_v21 }
 0x494   :  { %v398_v37 = vpop.permute.xlu1 %397 }
 0x495   :  { %441 = vmatpush.msra.mxu3 %v392_v19  ;;  %v404_v44 = vmul.f32 %v1101_v16, %v398_v37 }
 0x497   :  { %442 = vmatpush.msra.mxu3 %v391_v24 }
 0x499   :  { %443 = vmatpush.msra.mxu3 %v406_v36 }
 0x49b   :  { %444 = vmatpush.msra.mxu3 %v405_v38 }
 0x49d   :  { %445 = vmatpush.msra.mxu3 %v404_v44 }
 0x49f   :  { %446 = vmatpush.msra.mxu3 %v403_v45 }
 0x4a0   :  { %892 = vmatmul.msk.f32.vlgmr.msra.gmra.mxu3 %vm211_vm2, %v1266_v46 }
 0x4a8   :  { %893 = vmatmul.msk.f32.gmra.mxu3 %vm211_vm2, %v1270_v48 }
 0x4b0   :  { %894 = vmatmul.msk.f32.gmra.mxu3 %vm211_vm2, %v1274_v51 }
 0x4b8   :  { %895 = vmatmul.msk.f32.gmra.mxu3 %vm211_vm2, %v1278_v53 }
 0x523   :  { %v448_v54 = vpop.f32.mrf.mxu3 }
 0x52b   :  { %v451_v50 = vpop.f32.mrf.mxu3 }
 0x52c   :  { %v452_v34 = vadd.f32 %v451_v50, %v1195_v47 }
 0x52e   :  { %v1283_v57 = vmax.f32 %v452_v34, 0.0 }
 0x530   :  { %478 = vrot.lane.b32.xlu2 %v1283_v57, %s1040_s14 }
 0x533   :  { %v454_v58 = vpop.f32.mrf.mxu3 }
 0x534   :  { %v455_v59 = vadd.f32 %v454_v58, %v1200_v52  ;;  %v449_v52 = vadd.f32 %v448_v54, %v1214_v56 }
 0x536   :  { %v1288_v60 = vmax.f32 %v455_v59, 0.0  ;;  %v1302_v62 = vmax.f32 %v449_v52, 0.0 }
 0x538   :  { %480 = vrot.lane.b32.xlu1 %v1288_v60, %s1040_s14  ;;  %468 = vrot.lane.b32.xlu2 %v1288_v60, %s1038_s11 }
 0x53b   :  { %v457_v49 = vpop.f32.mrf.mxu3 }
 0x53c   :  { %v458_v61 = vadd.f32 %v457_v49, %v1207_v55 }
 0x53e   :  { %v1295_v47 = vmax.f32 %v458_v61, 0.0 }
 0x540   :  { %482 = vrot.lane.b32.xlu0 %v1295_v47, %s1040_s14  ;;  %470 = vrot.lane.b32.xlu1 %v1295_v47, %s1038_s11 }
 0x548   :  { %464 = vrot.lane.b32.xlu1 %v1302_v62, %s1038_s11  ;;  %476 = vrot.lane.b32.xlu0 %v1302_v62, %s1040_s14 }
 0x550   :  { %466 = vrot.lane.b32.xlu0 %v1283_v57, %s1038_s11 }
 0x58a   :  { %v479_v1 = vpop.permute.xlu2 %478 }
 0x58b   :  { %v485_v56 = vmul.f32 %v1103_v18, %v479_v1 }
 0x592   :  { %v469_v6 = vpop.permute.xlu2 %468 }
 0x593   :  { %v474_v19 = vmul.f32 %v1101_v16, %v469_v6 }
 0x5aa   :  { %v481_v55 = vpop.permute.xlu1 %480 }
 0x5ab   :  { %v486_v2 = vmul.f32 %v1103_v18, %v481_v55 }
 0x5b2   :  { %v483_v63 = vpop.permute.xlu0 %482  ;;  %v471_v5 = vpop.permute.xlu1 %470 }
 0x5b3   :  { %v487_v0 = vmul.f32 %v1103_v18, %v483_v63  ;;  %v475_v15 = vmul.f32 %v1101_v16, %v471_v5 }
 0x5b5   :  { %492 = vmatpush.msrb.mxu0 %v487_v0 }
 0x5b7   :  { %493 = vmatpush.msrb.mxu0 %v486_v2 }
 0x5b9   :  { %494 = vmatpush.msrb.mxu0 %v485_v56 }
 0x5ba   :  { %v477_v3 = vpop.permute.xlu0 %476  ;;  %v465_v20 = vpop.permute.xlu1 %464 }
 0x5bb   :  { %v484_v4 = vmul.f32 %v1103_v18, %v477_v3  ;;  %v472_v22 = vmul.f32 %v1101_v16, %v465_v20 }
 0x5bd   :  { %495 = vmatpush.msrb.mxu0 %v484_v4 }
 0x5bf   :  { %496 = vmatpush.msrb.mxu0 %v1295_v47 }
 0x5c1   :  { %497 = vmatpush.msrb.mxu0 %v1288_v60 }
 0x5c2   :  { %v467_v17 = vpop.permute.xlu0 %466 }
 0x5c3   :  { %498 = vmatpush.msrb.mxu0 %v1283_v57  ;;  %v473_v21 = vmul.f32 %v1101_v16, %v467_v17 }
 0x5c5   :  { %499 = vmatpush.msrb.mxu0 %v1302_v62 }
 0x5c7   :  { %500 = vmatpush.msrb.mxu0 %v475_v15 }
 0x5c9   :  { %501 = vmatpush.msrb.mxu0 %v474_v19 }
 0x5cb   :  { %502 = vmatpush.msrb.mxu0 %v473_v21 }
 0x5cd   :  { %503 = vmatpush.msrb.mxu0 %v472_v22 }
 0x5ce   :  { %896 = vmatmul.msk.f32.vlgmr.msrb.gmra.mxu0 %vm211_vm2, %v1146_v9 }
 0x5d6   :  { %897 = vmatmul.msk.f32.gmra.mxu0 %vm211_vm2, %v1150_v10 }
 0x5de   :  { %898 = vmatmul.msk.f32.gmra.mxu0 %vm211_vm2, %v1154_v11 }
 0x5e6   :  { %899 = vmatmul.msk.f32.gmra.mxu0 %vm211_vm2, %v1158_v12 }
 0x64b   :  { %v505_v23 = vpop.f32.mrf.mxu0 }
 0x64c   :  { %v517_v10 = vmax.f32 %v505_v23, 0.0 }
 0x653   :  { %v508_v24 = vpop.f32.mrf.mxu0 }
 0x654   :  { %v518_v25 = vmax.f32 %v508_v24, 0.0 }
 0x656   :  { %535 = vrot.lane.b32.xlu1 %v518_v25, %s1040_s14 }
 0x65b   :  { %v511_v26 = vpop.f32.mrf.mxu0 }
 0x65c   :  { %v519_v27 = vmax.f32 %v511_v26, 0.0 }
 0x65e   :  { %525 = vrot.lane.b32.xlu1 %v519_v27, %s1038_s11  ;;  %537 = vrot.lane.b32.xlu0 %v519_v27, %s1040_s14 }
 0x663   :  { %v514_v9 = vpop.f32.mrf.mxu0 }
 0x664   :  { %v520_v28 = vmax.f32 %v514_v9, 0.0 }
 0x666   :  { %527 = vrot.lane.b32.xlu0 %v520_v28, %s1038_s11  ;;  %539 = vrot.lane.b32.xlu2 %v520_v28, %s1040_s14 }
 0x66e   :  { %521 = vrot.lane.b32.xlu0 %v517_v10, %s1038_s11  ;;  %533 = vrot.lane.b32.xlu2 %v517_v10, %s1040_s14 }
 0x676   :  { %523 = vrot.lane.b32.xlu2 %v518_v25, %s1038_s11 }
 0x6c0   :  { %v540_v11 = vpop.permute.xlu2 %539 }
 0x6c1   :  { %v544_v12 = vmul.f32 %v1103_v18, %v540_v11 }
 0x6c3   :  { %549 = vmatpush.msrb.mxu1 %v544_v12 }
 0x6c8   :  { %v536_v29 = vpop.permute.xlu1 %535  ;;  %v534_v32 = vpop.permute.xlu2 %533 }
 0x6c9   :  { %v542_v33 = vmul.f32 %v1103_v18, %v536_v29  ;;  %v541_v35 = vmul.f32 %v1103_v18, %v534_v32 }
 0x6d0   :  { %v538_v30 = vpop.permute.xlu0 %537  ;;  %v526_v37 = vpop.permute.xlu1 %525 }
 0x6d1   :  { %v543_v31 = vmul.f32 %v1103_v18, %v538_v30  ;;  %v524_v39 = vpop.permute.xlu2 %523  ;;  %v531_v44 = vmul.f32 %v1101_v16, %v526_v37 }
 0x6d2   :  { %v530_v54 = vmul.f32 %v1101_v16, %v524_v39 }
 0x6d3   :  { %550 = vmatpush.msrb.mxu1 %v543_v31 }
 0x6d5   :  { %551 = vmatpush.msrb.mxu1 %v542_v33 }
 0x6d7   :  { %552 = vmatpush.msrb.mxu1 %v541_v35 }
 0x6d8   :  { %v528_v36 = vpop.permute.xlu0 %527 }
 0x6d9   :  { %553 = vmatpush.msrb.mxu1 %v520_v28  ;;  %v532_v38 = vmul.f32 %v1101_v16, %v528_v36 }
 0x6db   :  { %554 = vmatpush.msrb.mxu1 %v519_v27 }
 0x6dd   :  { %555 = vmatpush.msrb.mxu1 %v518_v25 }
 0x6df   :  { %556 = vmatpush.msrb.mxu1 %v517_v10 }
 0x6e0   :  { %v522_v45 = vpop.permute.xlu0 %521 }
 0x6e1   :  { %557 = vmatpush.msrb.mxu1 %v532_v38  ;;  %v529_v50 = vmul.f32 %v1101_v16, %v522_v45 }
 0x6e3   :  { %558 = vmatpush.msrb.mxu1 %v531_v44 }
 0x6e5   :  { %559 = vmatpush.msrb.mxu1 %v530_v54 }
 0x6e7   :  { %560 = vmatpush.msrb.mxu1 %v529_v50 }
 0x6e8   :  { %900 = vmatmul.msk.f32.vlgmr.msrb.gmra.mxu1 %vm211_vm2, %v1178_v40 }
 0x6f0   :  { %901 = vmatmul.msk.f32.gmra.mxu1 %vm211_vm2, %v1182_v41 }
 0x6f8   :  { %902 = vmatmul.msk.f32.gmra.mxu1 %vm211_vm2, %v1186_v42 }
 0x700   :  { %903 = vmatmul.msk.f32.gmra.mxu1 %vm211_vm2, %v1190_v43 }
 0x765   :  { %v562_v34 = vpop.f32.mrf.mxu1 }
 0x76d   :  { %v565_v58 = vpop.f32.mrf.mxu1 }
 0x76e   :  { %v566_v59 = vadd.f32 %v565_v58, %v1283_v57  ;;  %v563_v57 = vadd.f32 %v562_v34, %v1302_v62 }
 0x770   :  { %v1355_v49 = vmax.f32 %v566_v59, 0.0 }
 0x772   :  { %592 = vrot.lane.b32.xlu0 %v1355_v49, %s1040_s14 }
 0x775   :  { %v568_v61 = vpop.f32.mrf.mxu1 }
 0x776   :  { %v569_v40 = vadd.f32 %v568_v61, %v1288_v60  ;;  %v1374_v60 = vmax.f32 %v563_v57, 0.0 }
 0x778   :  { %v1360_v52 = vmax.f32 %v569_v40, 0.0 }
 0x77a   :  { %594 = vrot.lane.b32.xlu2 %v1360_v52, %s1040_s14  ;;  %582 = vrot.lane.b32.xlu0 %v1360_v52, %s1038_s11 }
 0x77d   :  { %v571_v41 = vpop.f32.mrf.mxu1 }
 0x77e   :  { %v572_v42 = vadd.f32 %v571_v41, %v1295_v47 }
 0x780   :  { %v1367_v43 = vmax.f32 %v572_v42, 0.0 }
 0x782   :  { %596 = vrot.lane.b32.xlu1 %v1367_v43, %s1040_s14  ;;  %584 = vrot.lane.b32.xlu2 %v1367_v43, %s1038_s11 }
 0x78a   :  { %578 = vrot.lane.b32.xlu2 %v1374_v60, %s1038_s11  ;;  %590 = vrot.lane.b32.xlu1 %v1374_v60, %s1040_s14 }
 0x792   :  { %580 = vrot.lane.b32.xlu1 %v1355_v49, %s1038_s11 }
 0x7d4   :  { %v595_v47 = vpop.permute.xlu2 %594 }
 0x7d5   :  { %v600_v1 = vmul.f32 %v1103_v18, %v595_v47 }
 0x7dc   :  { %v585_v3 = vpop.permute.xlu2 %584 }
 0x7dd   :  { %v589_v5 = vmul.f32 %v1101_v16, %v585_v3  ;;  %v693_v3 = vld [vmem:[%s1497_s3 + $0x8] sm:$0xff] }
 0x7e4   :  { %v593_v0 = vpop.permute.xlu0 %592  ;;  %v579_v17 = vpop.permute.xlu2 %578 }
 0x7e5   :  { %v599_v62 = vmul.f32 %v1103_v18, %v593_v0  ;;  %v586_v20 = vmul.f32 %v1101_v16, %v579_v17 }
 0x7ec   :  { %v583_v4 = vpop.permute.xlu0 %582 }
 0x7ed   :  { %v588_v15 = vmul.f32 %v1101_v16, %v583_v4  ;;  %v695_v4 = vld [vmem:[%s1497_s3 + $0x18] sm:$0xff] }
 0x7f4   :  { %v597_v55 = vpop.permute.xlu1 %596 }
 0x7f5   :  { %v601_v63 = vmul.f32 %v1103_v18, %v597_v55 }
 0x7f7   :  { %606 = vmatpush.msrb.mxu2 %v601_v63 }
 0x7f9   :  { %607 = vmatpush.msrb.mxu2 %v600_v1 }
 0x7fb   :  { %608 = vmatpush.msrb.mxu2 %v599_v62 }
 0x7fc   :  { %v591_v2 = vpop.permute.xlu1 %590 }
 0x7fd   :  { %v598_v56 = vmul.f32 %v1103_v18, %v591_v2  ;;  %v692_v2 = vld [vmem:[%s1497_s3] sm:$0xff] }
 0x7ff   :  { %609 = vmatpush.msrb.mxu2 %v598_v56  ;;  %v694_v56 = vld [vmem:[%s1497_s3 + $0x10] sm:$0xff] }
 0x801   :  { %610 = vmatpush.msrb.mxu2 %v1367_v43 }
 0x803   :  { %611 = vmatpush.msrb.mxu2 %v1360_v52 }
 0x804   :  { %v581_v6 = vpop.permute.xlu1 %580 }
 0x805   :  { %612 = vmatpush.msrb.mxu2 %v1355_v49  ;;  %v587_v19 = vmul.f32 %v1101_v16, %v581_v6 }
 0x807   :  { %613 = vmatpush.msrb.mxu2 %v1374_v60 }
 0x809   :  { %614 = vmatpush.msrb.mxu2 %v589_v5 }
 0x80b   :  { %615 = vmatpush.msrb.mxu2 %v588_v15 }
 0x80d   :  { %616 = vmatpush.msrb.mxu2 %v587_v19 }
 0x80f   :  { %617 = vmatpush.msrb.mxu2 %v586_v20 }
 0x810   :  { %904 = vmatmul.msk.f32.vlgmr.msrb.gmra.mxu2 %vm211_vm2, %v1234_v7 }
 0x818   :  { %905 = vmatmul.msk.f32.gmra.mxu2 %vm211_vm2, %v1238_v8 }
 0x820   :  { %906 = vmatmul.msk.f32.gmra.mxu2 %vm211_vm2, %v1242_v13 }
 0x828   :  { %907 = vmatmul.msk.f32.gmra.mxu2 %vm211_vm2, %v1246_v14 }
 0x893   :  { %v619_v21 = vpop.f32.mrf.mxu2 }
 0x894   :  { %v631_v8 = vmax.f32 %v619_v21, 0.0 }
 0x89b   :  { %v622_v22 = vpop.f32.mrf.mxu2 }
 0x89c   :  { %v632_v23 = vmax.f32 %v622_v22, 0.0 }
 0x89e   :  { %649 = vrot.lane.b32.xlu2 %v632_v23, %s1040_s14 }
 0x8a3   :  { %v625_v24 = vpop.f32.mrf.mxu2 }
 0x8a4   :  { %v633_v25 = vmax.f32 %v625_v24, 0.0 }
 0x8a6   :  { %639 = vrot.lane.b32.xlu2 %v633_v25, %s1038_s11  ;;  %651 = vrot.lane.b32.xlu1 %v633_v25, %s1040_s14 }
 0x8ab   :  { %v628_v7 = vpop.f32.mrf.mxu2 }
 0x8ac   :  { %v634_v26 = vmax.f32 %v628_v7, 0.0 }
 0x8ae   :  { %641 = vrot.lane.b32.xlu1 %v634_v26, %s1038_s11  ;;  %653 = vrot.lane.b32.xlu0 %v634_v26, %s1040_s14 }
 0x8b6   :  { %635 = vrot.lane.b32.xlu1 %v631_v8, %s1038_s11  ;;  %647 = vrot.lane.b32.xlu0 %v631_v8, %s1040_s14 }
 0x8be   :  { %637 = vrot.lane.b32.xlu0 %v632_v23, %s1038_s11 }
 0x8f8   :  { %v650_v9 = vpop.permute.xlu2 %649 }
 0x8f9   :  { %v656_v10 = vmul.f32 %v1103_v18, %v650_v9 }
 0x900   :  { %v640_v30 = vpop.permute.xlu2 %639 }
 0x901   :  { %v645_v33 = vmul.f32 %v1101_v16, %v640_v30 }
 0x918   :  { %v652_v13 = vpop.permute.xlu1 %651 }
 0x919   :  { %v657_v28 = vmul.f32 %v1103_v18, %v652_v13 }
 0x920   :  { %v654_v14 = vpop.permute.xlu0 %653  ;;  %v642_v29 = vpop.permute.xlu1 %641 }
 0x921   :  { %v658_v27 = vmul.f32 %v1103_v18, %v654_v14  ;;  %v646_v31 = vmul.f32 %v1101_v16, %v642_v29 }
 0x923   :  { %663 = vmatpush.msrb.mxu3 %v658_v27 }
 0x925   :  { %664 = vmatpush.msrb.mxu3 %v657_v28 }
 0x927   :  { %665 = vmatpush.msrb.mxu3 %v656_v10 }
 0x928   :  { %v648_v11 = vpop.permute.xlu0 %647  ;;  %v636_v35 = vpop.permute.xlu1 %635 }
 0x929   :  { %v655_v12 = vmul.f32 %v1103_v18, %v648_v11  ;;  %v643_v37 = vmul.f32 %v1101_v16, %v636_v35 }
 0x92b   :  { %666 = vmatpush.msrb.mxu3 %v655_v12 }
 0x92d   :  { %667 = vmatpush.msrb.mxu3 %v634_v26 }
 0x92f   :  { %668 = vmatpush.msrb.mxu3 %v633_v25 }
 0x930   :  { %v638_v32 = vpop.permute.xlu0 %637 }
 0x931   :  { %669 = vmatpush.msrb.mxu3 %v632_v23  ;;  %v644_v36 = vmul.f32 %v1101_v16, %v638_v32  ;;  %v766_v32 = vld [vmem:[#allocation5 + $0x8] sm:$0xff] }
 0x933   :  { %670 = vmatpush.msrb.mxu3 %v631_v8 }
 0x935   :  { %671 = vmatpush.msrb.mxu3 %v646_v31  ;;  %v765_v31 = vld [vmem:[#allocation5] sm:$0xff] }
 0x937   :  { %672 = vmatpush.msrb.mxu3 %v645_v33 }
 0x939   :  { %673 = vmatpush.msrb.mxu3 %v644_v36 }
 0x93b   :  { %674 = vmatpush.msrb.mxu3 %v643_v37 }
 0x93c   :  { %908 = vmatmul.msk.f32.vlgmr.msrb.gmra.mxu3 %vm211_vm2, %v1266_v46 }
 0x944   :  { %909 = vmatmul.msk.f32.gmra.mxu3 %vm211_vm2, %v1270_v48 }
 0x94c   :  { %910 = vmatmul.msk.f32.gmra.mxu3 %vm211_vm2, %v1274_v51 }
 0x954   :  { %911 = vmatmul.msk.f32.gmra.mxu3 %vm211_vm2, %v1278_v53 }
 0x9bf   :  { %v676_v38 = vpop.f32.mrf.mxu3 }
 0x9c0   :  { %v677_v53 = vadd.f32 %v676_v38, %v1374_v60 }
 0x9c2   :  { %v688_v58 = vmax.f32 %v677_v53, 0.0 }
 0x9c7   :  { %v679_v39 = vpop.f32.mrf.mxu3 }
 0x9c8   :  { %v680_v44 = vadd.f32 %v679_v39, %v1355_v49 }
 0x9ca   :  { %v689_v45 = vmax.f32 %v680_v44, 0.0 }
 0x9cc   :  { %710 = vrot.lane.b32.xlu1 %v689_v45, %s1040_s14 }
 0x9cf   :  { %v682_v54 = vpop.f32.mrf.mxu3 }
 0x9d0   :  { %v683_v50 = vadd.f32 %v682_v54, %v1360_v52 }
 0x9d2   :  { %v690_v46 = vmax.f32 %v683_v50, 0.0 }
 0x9d4   :  { %712 = vrot.lane.b32.xlu0 %v690_v46, %s1040_s14  ;;  %700 = vrot.lane.b32.xlu1 %v690_v46, %s1038_s11 }
 0x9d7   :  { %v685_v48 = vpop.f32.mrf.mxu3 }
 0x9d8   :  { %v686_v51 = vadd.f32 %v685_v48, %v1367_v43 }
 0x9da   :  { %v691_v34 = vmax.f32 %v686_v51, 0.0  ;;  %v822_v51 = vld [vmem:[%s1499_s5] sm:$0x3] }
 0x9dc   :  { %714 = vrot.lane.b32.xlu2 %v691_v34, %s1040_s14  ;;  %702 = vrot.lane.b32.xlu0 %v691_v34, %s1038_s11 }
 0x9e4   :  { %696 = vrot.lane.b32.xlu0 %v688_v58, %s1038_s11  ;;  %708 = vrot.lane.b32.xlu2 %v688_v58, %s1040_s14 }
 0x9ec   :  { %698 = vrot.lane.b32.xlu2 %v689_v45, %s1038_s11 }
 0xa36   :  { %v715_v59 = vpop.permute.xlu2 %714 }
 0xa37   :  { %v719_v49 = vmul.f32 %v1103_v18, %v715_v59 }
 0xa39   :  { %736 = vmatpush.msra.mxu0 %v719_v49  ;;  %919 = vmatpush.msra.mxu3 %v719_v49 }
 0xa3e   :  { %v711_v61 = vpop.permute.xlu1 %710  ;;  %v709_v41 = vpop.permute.xlu2 %708 }
 0xa3f   :  { %v717_v42 = vmul.f32 %v1103_v18, %v711_v61  ;;  %v716_v43 = vmul.f32 %v1103_v18, %v709_v41 }
 0xa46   :  { %v713_v40 = vpop.permute.xlu0 %712  ;;  %v701_v60 = vpop.permute.xlu1 %700 }
 0xa47   :  { %v718_v52 = vmul.f32 %v1103_v18, %v713_v40  ;;  %v699_v55 = vpop.permute.xlu2 %698  ;;  %v706_v63 = vmul.f32 %v1101_v16, %v701_v60 }
 0xa48   :  { %v705_v1 = vmul.f32 %v1101_v16, %v699_v55 }
 0xa49   :  { %737 = vmatpush.msra.mxu0 %v718_v52  ;;  %920 = vmatpush.msra.mxu3 %v718_v52 }
 0xa4b   :  { %738 = vmatpush.msra.mxu0 %v717_v42  ;;  %921 = vmatpush.msra.mxu3 %v717_v42 }
 0xa4d   :  { %739 = vmatpush.msra.mxu0 %v716_v43  ;;  %922 = vmatpush.msra.mxu3 %v716_v43 }
 0xa4e   :  { %v703_v57 = vpop.permute.xlu0 %702 }
 0xa4f   :  { %740 = vmatpush.msra.mxu0 %v691_v34  ;;  %923 = vmatpush.msra.mxu3 %v691_v34  ;;  %v707_v47 = vmul.f32 %v1101_v16, %v703_v57 }
 0xa51   :  { %741 = vmatpush.msra.mxu0 %v690_v46  ;;  %924 = vmatpush.msra.mxu3 %v690_v46 }
 0xa53   :  { %742 = vmatpush.msra.mxu0 %v689_v45  ;;  %925 = vmatpush.msra.mxu3 %v689_v45 }
 0xa55   :  { %743 = vmatpush.msra.mxu0 %v688_v58  ;;  %926 = vmatpush.msra.mxu3 %v688_v58 }
 0xa56   :  { %v697_v0 = vpop.permute.xlu0 %696 }
 0xa57   :  { %744 = vmatpush.msra.mxu0 %v707_v47  ;;  %927 = vmatpush.msra.mxu3 %v707_v47  ;;  %v704_v62 = vmul.f32 %v1101_v16, %v697_v0 }
 0xa59   :  { %745 = vmatpush.msra.mxu0 %v706_v63  ;;  %928 = vmatpush.msra.mxu3 %v706_v63 }
 0xa5b   :  { %746 = vmatpush.msra.mxu0 %v705_v1  ;;  %929 = vmatpush.msra.mxu3 %v705_v1 }
 0xa5d   :  { %747 = vmatpush.msra.mxu0 %v704_v62  ;;  %930 = vmatpush.msra.mxu3 %v704_v62 }
 0xa5e   :  { %912 = vmatmul.msk.f32.vlgmr.msra.gmra.mxu0 %vm211_vm2, %v692_v2  ;;  %914 = vmatmul.msk.f32.vlgmr.msra.gmra.mxu3 %vm211_vm2, %v694_v56 }
 0xa66   :  { %913 = vmatmul.msk.f32.gmra.mxu0 %vm211_vm2, %v693_v3  ;;  %915 = vmatmul.msk.f32.gmra.mxu3 %vm211_vm2, %v695_v4 }
 0xadb   :  { %v749_v5 = vpop.f32.mrf.mxu0 }
 0xadc   :  { %v761_v22 = vmax.f32 %v749_v5, 0.0 }
 0xae1   :  { %v755_v6 = vpop.f32.mrf.mxu3 }
 0xae2   :  { %v763_v15 = vmax.f32 %v755_v6, 0.0 }
 0xae3   :  { %v752_v17 = vpop.f32.mrf.mxu0 }
 0xae4   :  { %v762_v19 = vmax.f32 %v752_v17, 0.0  ;;  %783 = vrot.lane.b32.xlu2 %v763_v15, %s1040_s14 }
 0xae6   :  { %781 = vrot.lane.b32.xlu0 %v762_v19, %s1040_s14 }
 0xae9   :  { %v758_v20 = vpop.f32.mrf.mxu3 }
 0xaea   :  { %v764_v21 = vmax.f32 %v758_v20, 0.0 }
 0xaec   :  { %773 = vrot.lane.b32.xlu2 %v764_v21, %s1038_s11  ;;  %785 = vrot.lane.b32.xlu1 %v764_v21, %s1040_s14 }
 0xaee   :  { %771 = vrot.lane.b32.xlu0 %v763_v15, %s1038_s11 }
 0xaf4   :  { %767 = vrot.lane.b32.xlu2 %v761_v22, %s1038_s11  ;;  %779 = vrot.lane.b32.xlu1 %v761_v22, %s1040_s14 }
 0xafc   :  { %769 = vrot.lane.b32.xlu1 %v762_v19, %s1038_s11 }
 0xb3e   :  { %v784_v23 = vpop.permute.xlu2 %783 }
 0xb3f   :  { %v789_v26 = vmul.f32 %v1103_v18, %v784_v23 }
 0xb46   :  { %v774_v27 = vpop.permute.xlu2 %773 }
 0xb47   :  { %v778_v28 = vmul.f32 %v1101_v16, %v774_v27 }
 0xb4e   :  { %v768_v12 = vpop.permute.xlu2 %767 }
 0xb4f   :  { %v775_v30 = vmul.f32 %v1101_v16, %v768_v12 }
 0xb58   :  { %v782_v7 = vpop.permute.xlu0 %781 }
 0xb59   :  { %v788_v8 = vmul.f32 %v1103_v18, %v782_v7 }
 0xb5e   :  { %v786_v24 = vpop.permute.xlu1 %785 }
 0xb5f   :  { %v790_v25 = vmul.f32 %v1103_v18, %v786_v24 }
 0xb60   :  { %v772_v9 = vpop.permute.xlu0 %771 }
 0xb61   :  { %801 = vmatpush.msra.mxu1 %v790_v25  ;;  %v777_v11 = vmul.f32 %v1101_v16, %v772_v9 }
 0xb63   :  { %802 = vmatpush.msra.mxu1 %v789_v26 }
 0xb65   :  { %803 = vmatpush.msra.mxu1 %v788_v8 }
 0xb66   :  { %v780_v13 = vpop.permute.xlu1 %779 }
 0xb67   :  { %v787_v14 = vmul.f32 %v1103_v18, %v780_v13 }
 0xb69   :  { %804 = vmatpush.msra.mxu1 %v787_v14 }
 0xb6b   :  { %805 = vmatpush.msra.mxu1 %v764_v21 }
 0xb6d   :  { %806 = vmatpush.msra.mxu1 %v763_v15 }
 0xb6e   :  { %v770_v10 = vpop.permute.xlu1 %769 }
 0xb6f   :  { %807 = vmatpush.msra.mxu1 %v762_v19  ;;  %v776_v29 = vmul.f32 %v1101_v16, %v770_v10 }
 0xb71   :  { %808 = vmatpush.msra.mxu1 %v761_v22 }
 0xb73   :  { %809 = vmatpush.msra.mxu1 %v778_v28 }
 0xb75   :  { %810 = vmatpush.msra.mxu1 %v777_v11 }
 0xb77   :  { %811 = vmatpush.msra.mxu1 %v776_v29 }
 0xb79   :  { %812 = vmatpush.msra.mxu1 %v775_v30 }
 0xb7a   :  { %916 = vmatmul.msk.f32.vlgmr.msra.gmra.mxu1 %vm211_vm2, %v765_v31 }
 0xb82   :  { %917 = vmatmul.msk.f32.gmra.mxu1 %vm211_vm2, %v766_v32 }
 0xbf7   :  { %v814_v33 = vpop.f32.mrf.mxu1 }
 0xbf8   :  { %v820_v35 = vmax.f32 %v814_v33, 0.0 }
 0xbfa   :  { %829 = vrot.lane.b32.xlu1 %v820_v35, %s1040_s14 }
 0xbff   :  { %v817_v36 = vpop.f32.mrf.mxu1 }
 0xc00   :  { %v821_v37 = vmax.f32 %v817_v36, 0.0 }
 0xc02   :  { %825 = vrot.lane.b32.xlu2 %v821_v37, %s1038_s11  ;;  %831 = vrot.lane.b32.xlu0 %v821_v37, %s1040_s14 }
 0xc0a   :  { %823 = vrot.lane.b32.xlu0 %v820_v35, %s1038_s11 }
 0xc5c   :  { %v826_v54 = vpop.permute.xlu2 %825 }
 0xc5d   :  { %v828_v46 = vmul.f32 %v1101_v16, %v826_v54 }
 0xc6c   :  { %v830_v38 = vpop.permute.xlu1 %829 }
 0xc6d   :  { %v833_v45 = vmul.f32 %v1103_v18, %v830_v38 }
 0xc74   :  { %v832_v39 = vpop.permute.xlu0 %831 }
 0xc75   :  { %v834_v44 = vmul.f32 %v1103_v18, %v832_v39 }
 0xc77   :  { %849 = vmatpush.msra.mxu2 %v834_v44 }
 0xc79   :  { %850 = vmatpush.msra.mxu2 %v833_v45 }
 0xc7b   :  { %851 = vmatpush.msra.mxu2 %v821_v37 }
 0xc7c   :  { %v824_v50 = vpop.permute.xlu0 %823 }
 0xc7d   :  { %852 = vmatpush.msra.mxu2 %v820_v35  ;;  %v827_v48 = vmul.f32 %v1101_v16, %v824_v50 }
 0xc7f   :  { %853 = vmatpush.msra.mxu2 %v828_v46 }
 0xc81   :  { %854 = vmatpush.msra.mxu2 %v827_v48 }
 0xc82   :  { %918 = vmatmul.msk.f32.vlgmr.msra.gmra.mxu2 %vm835_vm3, %v822_v51 }
 0xd05   :  { %v856_v18 = vpop.f32.mrf.mxu2 }
 0xd06   :  { %859 = vst [vmem:[#allocation7] sm:$0x3] %v856_v18 }
 0xd07   :  { %870 = dma.vmem_to_hbm [thread:$0]  %s866_s29, 32, %s868_s8, [#allocation4]  }
 0xd08   :  { %1030 = dma.done.wait [#allocation4], 32  }
 0xd09   :  { %1031 = vsyncadd [#allocation4], 4294967264 }
 0xd0a   :  { %875 = vsyncpa [#allocation3], 1 }
 0xd0b   :  { %876 = vsyncpa [#allocation6], 1 }
 0xd0c   :  { %877 = vsyncpa [#allocation4], 1 }

</bundles_post_ra>
